<compile_context>
chip_gen: v7x
topology: tpu7x:2x2x1
jax: 0.10.0
libtpu: 0.0.40
codegen_flags: <defaults>
</compile_context>

<pallas_src>
import functools

import numpy as np
import jax
import jax.numpy as jnp
from jax.experimental import pallas as pl
from jax.experimental.pallas import tpu as pltpu


def _shift_lanes(x, s):
    """shifted[:, p] = x[:, p + s], zero-filled at the ends (static s)."""
    C, L = x.shape
    if s == 0:
        return x
    zeros = jnp.zeros((C, abs(s)), dtype=x.dtype)
    if s > 0:
        return jnp.concatenate([x[:, s:], zeros], axis=-1)
    return jnp.concatenate([zeros, x[:, :L + s]], axis=-1)


def _fused_conv_kernel(x_ref, mask_ref, w1_ref, b1_ref, w2_ref, b2_ref, o_ref,
                       *, W):
    """Fused 3x3 'same' conv pair for one block of images.

    x_ref   : (Cin, L)        flat NCHW input slab, L = batch_block * H * W
    mask_ref: (9, L)          f32 border-validity mask per 3x3 tap
    w1_ref  : (Cmid, 9*Cin)   conv1 weight, im2col layout, output-channel-major
    b1_ref  : (Cmid, 1)       conv1 bias
    w2_ref  : (Cout, 9*Cmid)  conv2 weight
    b2_ref  : (Cout, 1)       conv2 bias
    o_ref   : (Cout, L)       lane-dense output block
    """
    masks = mask_ref[...]                       # (9, L)

    def im2col(img):
        # img (C, L) -> patches (9*C, L); taps stacked along sublanes only.
        taps = []
        for kh in range(3):
            for kw in range(3):
                dh, dw = kh - 1, kw - 1
                s = dh * W + dw
                if s == 0:
                    taps.append(img)            # center tap: mask is all-ones
                else:
                    k = kh * 3 + kw
                    taps.append(_shift_lanes(img, s) * masks[k:k + 1, :])
        return jnp.concatenate(taps, axis=0)

    # conv1: (Cmid, 9*Cin) @ (9*Cin, L) -> (Cmid, L); lane dim is spatial.
    y1 = jnp.dot(w1_ref[...], im2col(x_ref[...]),
                 preferred_element_type=jnp.float32) + b1_ref[...]

    # conv2 consumes y1 directly (no padded scratch, no HBM round-trip).
    y2 = jnp.dot(w2_ref[...], im2col(y1),
                 preferred_element_type=jnp.float32) + b2_ref[...]

    o_ref[...] = y2.astype(o_ref.dtype)


def _build_tap_masks(H, W, batch_block):
    """(9, batch_block*H*W) f32: 1 where the (kh, kw) tap is in-bounds."""
    h = np.repeat(np.arange(H), W)
    w = np.tile(np.arange(W), H)
    rows = []
    for kh in range(3):
        for kw in range(3):
            dh, dw = kh - 1, kw - 1
            ok = (h + dh >= 0) & (h + dh < H) & (w + dw >= 0) & (w + dw < W)
            rows.append(ok)
    m = np.stack(rows, axis=0).astype(np.float32)            # (9, H*W)
    return jnp.asarray(np.tile(m, (1, batch_block)))          # (9, L)


def _pick_batch_block(N, HW):
    """Largest batch block <= 8 that keeps blocks lane-aligned and, when
    possible, leaves >= 2 parallel grid steps (both v7x TensorCores busy)."""
    best = 1
    for bb in range(1, min(N, 8) + 1):
        if N % bb:
            continue
        if N >= 2 and N // bb < 2:
            continue
        if bb != N and (bb * HW) % 128 != 0:
            continue
        best = bb
    return best


def conv_layers_fused(x_nchw, w1, b1, w2, b2, *, batch_block=None):
    """x_nchw: (N, Cin, H, W); w1: (3,3,Cin,Cmid) HWIO; w2: (3,3,Cmid,Cout)."""
    N, Cin, H, W = x_nchw.shape
    Cmid = w1.shape[-1]
    Cout = w2.shape[-1]
    HW = H * W

    if batch_block is None:
        batch_block = _pick_batch_block(N, HW)
    assert N % batch_block == 0
    grid_n = N // batch_block
    L = batch_block * HW

    # Channels-first, spatially flat input: DMA and in-kernel taps lane-dense.
    x_flat = jnp.transpose(x_nchw, (1, 0, 2, 3)).reshape(Cin, N * HW)

    # im2col weights, transposed so the matmul result's lane dim is spatial:
    #   Wt[co, (kh*3 + kw)*Ci + ci] = w_hwio[kh, kw, ci, co]
    w1t = jnp.transpose(w1, (3, 0, 1, 2)).reshape(Cmid, 9 * Cin)
    w2t = jnp.transpose(w2, (3, 0, 1, 2)).reshape(Cout, 9 * Cmid)

    masks = _build_tap_masks(H, W, batch_block)

    kernel = functools.partial(_fused_conv_kernel, W=W)

    out_flat = pl.pallas_call(
        kernel,
        out_shape=jax.ShapeDtypeStruct((Cout, N * HW), x_nchw.dtype),
        grid=(grid_n,),
        in_specs=[
            pl.BlockSpec((Cin, L), lambda n: (0, n)),
            pl.BlockSpec((9, L), lambda n: (0, 0)),
            pl.BlockSpec((Cmid, 9 * Cin), lambda n: (0, 0)),
            pl.BlockSpec((Cmid, 1), lambda n: (0, 0)),
            pl.BlockSpec((Cout, 9 * Cmid), lambda n: (0, 0)),
            pl.BlockSpec((Cout, 1), lambda n: (0, 0)),
        ],
        out_specs=pl.BlockSpec((Cout, L), lambda n: (0, n)),
        compiler_params=pltpu.CompilerParams(
            dimension_semantics=("parallel",),
            vmem_limit_bytes=32 * 1024 * 1024),
    )(x_flat, masks, w1t, b1, w2t, b2)

    # (Cout, N*H*W) -> (N, Cout, H, W): pure reshape + one small transpose.
    return jnp.transpose(out_flat.reshape(Cout, N, H, W), (1, 0, 2, 3))


class ConvLayersPallas:
    """Deterministic re-implementation of Conv_Layers (PyTorch, NCHW in/out)."""

    def __init__(self, in_channels: int = 3, key=jax.random.PRNGKey(42)):
        k1, k2, k3, k4 = jax.random.split(key, 4)
        mid = in_channels * 4
        # PyTorch conv weights are (Cout, Cin, 3, 3); we store HWIO (3,3,Cin,Cout).
        bound1 = 1.0 / jnp.sqrt(in_channels * 9.0)
        bound2 = 1.0 / jnp.sqrt(mid * 9.0)
        self.w1 = jax.random.uniform(k1, (3, 3, in_channels, mid),
                                     jnp.float32, -bound1, bound1)
        self.b1 = jax.random.uniform(k2, (mid, 1), jnp.float32, -bound1, bound1)
        self.w2 = jax.random.uniform(k3, (3, 3, mid, in_channels),
                                     jnp.float32, -bound2, bound2)
        self.b2 = jax.random.uniform(k4, (in_channels, 1),
                                     jnp.float32, -bound2, bound2)

    def __call__(self, x_nchw):
        return conv_layers_fused(x_nchw, self.w1, self.b1, self.w2, self.b2)


def _ref_forward(x_nchw, m: ConvLayersPallas):
    """Pure-JAX reference (XLA conv) for correctness checking."""
    x = jnp.transpose(x_nchw, (0, 2, 3, 1))
    dn = ("NHWC", "HWIO", "NHWC")
    y = jax.lax.conv_general_dilated(x, m.w1, (1, 1), "SAME",
                                     dimension_numbers=dn) + m.b1[:, 0]
    y = jax.lax.conv_general_dilated(y, m.w2, (1, 1), "SAME",
                                     dimension_numbers=dn) + m.b2[:, 0]
    return jnp.transpose(y, (0, 3, 1, 2))


if __name__ == "__main__":
    in_channels = 4
    N, H, W = 2, 16, 16
    x = jax.random.normal(jax.random.PRNGKey(0), (N, in_channels, H, W),
                          dtype=jnp.float32)                 # NCHW, like PyTorch

    model = ConvLayersPallas(in_channels=in_channels)

    out = jax.block_until_ready(model(x))
    ref = jax.block_until_ready(_ref_forward(x, model))

    assert out.shape == (N, in_channels, H, W), out.shape
    assert jnp.allclose(out, ref, rtol=1e-4, atol=1e-4), (
        float(jnp.max(jnp.abs(out - ref))))

    print("KERNEL_OK")
</pallas_src>

<mosaic_0001>
module attributes {stable_mosaic.version = 11 : i64} {
  func.func @_fused_conv_kernel(%arg0: i32, %arg1: memref<4x256xf32, #tpu.memory_space<vmem>>, %arg2: memref<9x256xf32, #tpu.memory_space<vmem>>, %arg3: memref<16x36xf32, #tpu.memory_space<vmem>>, %arg4: memref<16x1xf32, #tpu.memory_space<vmem>>, %arg5: memref<4x144xf32, #tpu.memory_space<vmem>>, %arg6: memref<4x1xf32, #tpu.memory_space<vmem>>, %arg7: memref<4x256xf32, #tpu.memory_space<vmem>>) attributes {dimension_semantics = [#tpu.dimension_semantics<parallel>], iteration_bounds = array<i64: 2>, scalar_prefetch = 0 : i64, scratch_operands = 0 : i64, tpu.core_type = #tpu.core_type<tc>, window_params = [{transform_indices = @transform_0, window_bounds = array<i64: 4, 256>}, {pipeline_mode = #tpu.pipeline_mode<synchronous>, transform_indices = @transform_1, window_bounds = array<i64: 9, 256>}, {pipeline_mode = #tpu.pipeline_mode<synchronous>, transform_indices = @transform_2, window_bounds = array<i64: 16, 36>}, {pipeline_mode = #tpu.pipeline_mode<synchronous>, transform_indices = @transform_3, window_bounds = array<i64: 16, 1>}, {pipeline_mode = #tpu.pipeline_mode<synchronous>, transform_indices = @transform_4, window_bounds = array<i64: 4, 144>}, {pipeline_mode = #tpu.pipeline_mode<synchronous>, transform_indices = @transform_5, window_bounds = array<i64: 4, 1>}, {transform_indices = @transform_6, window_bounds = array<i64: 4, 256>}]} {
    %c0 = arith.constant 0 : index
    %c0_0 = arith.constant 0 : index
    %0 = vector.load %arg2[%c0, %c0_0] : memref<9x256xf32, #tpu.memory_space<vmem>>, vector<9x256xf32>
    %c0_1 = arith.constant 0 : index
    %c0_2 = arith.constant 0 : index
    %1 = vector.load %arg3[%c0_1, %c0_2] : memref<16x36xf32, #tpu.memory_space<vmem>>, vector<16x36xf32>
    %c0_3 = arith.constant 0 : index
    %c0_4 = arith.constant 0 : index
    %2 = vector.load %arg1[%c0_3, %c0_4] : memref<4x256xf32, #tpu.memory_space<vmem>>, vector<4x256xf32>
    %cst = arith.constant 0.000000e+00 : f32
    %3 = vector.broadcast %cst : f32 to vector<4x17xf32>
    %4 = vector.extract_strided_slice %2 {offsets = [0, 0], sizes = [4, 239], strides = [1, 1]} : vector<4x256xf32> to vector<4x239xf32>
    %5 = tpu.concatenate %3, %4 in 1 : vector<4x17xf32>, vector<4x239xf32> -> vector<4x256xf32>
    %6 = vector.extract_strided_slice %0 {offsets = [0, 0], sizes = [1, 256], strides = [1, 1]} : vector<9x256xf32> to vector<1x256xf32>
    %7 = vector.broadcast %6 : vector<1x256xf32> to vector<4x256xf32>
    %8 = arith.mulf %5, %7 : vector<4x256xf32>
    %cst_5 = arith.constant 0.000000e+00 : f32
    %9 = vector.broadcast %cst_5 : f32 to vector<4x16xf32>
    %10 = vector.extract_strided_slice %2 {offsets = [0, 0], sizes = [4, 240], strides = [1, 1]} : vector<4x256xf32> to vector<4x240xf32>
    %11 = tpu.concatenate %9, %10 in 1 : vector<4x16xf32>, vector<4x240xf32> -> vector<4x256xf32>
    %12 = vector.extract_strided_slice %0 {offsets = [1, 0], sizes = [1, 256], strides = [1, 1]} : vector<9x256xf32> to vector<1x256xf32>
    %13 = vector.broadcast %12 : vector<1x256xf32> to vector<4x256xf32>
    %14 = arith.mulf %11, %13 : vector<4x256xf32>
    %cst_6 = arith.constant 0.000000e+00 : f32
    %15 = vector.broadcast %cst_6 : f32 to vector<4x15xf32>
    %16 = vector.extract_strided_slice %2 {offsets = [0, 0], sizes = [4, 241], strides = [1, 1]} : vector<4x256xf32> to vector<4x241xf32>
    %17 = tpu.concatenate %15, %16 in 1 : vector<4x15xf32>, vector<4x241xf32> -> vector<4x256xf32>
    %18 = vector.extract_strided_slice %0 {offsets = [2, 0], sizes = [1, 256], strides = [1, 1]} : vector<9x256xf32> to vector<1x256xf32>
    %19 = vector.broadcast %18 : vector<1x256xf32> to vector<4x256xf32>
    %20 = arith.mulf %17, %19 : vector<4x256xf32>
    %cst_7 = arith.constant 0.000000e+00 : f32
    %21 = vector.broadcast %cst_7 : f32 to vector<4x1xf32>
    %22 = vector.extract_strided_slice %2 {offsets = [0, 0], sizes = [4, 255], strides = [1, 1]} : vector<4x256xf32> to vector<4x255xf32>
    %23 = tpu.concatenate %21, %22 in 1 : vector<4x1xf32>, vector<4x255xf32> -> vector<4x256xf32>
    %24 = vector.extract_strided_slice %0 {offsets = [3, 0], sizes = [1, 256], strides = [1, 1]} : vector<9x256xf32> to vector<1x256xf32>
    %25 = vector.broadcast %24 : vector<1x256xf32> to vector<4x256xf32>
    %26 = arith.mulf %23, %25 : vector<4x256xf32>
    %cst_8 = arith.constant 0.000000e+00 : f32
    %27 = vector.broadcast %cst_8 : f32 to vector<4x1xf32>
    %28 = vector.extract_strided_slice %2 {offsets = [0, 1], sizes = [4, 255], strides = [1, 1]} : vector<4x256xf32> to vector<4x255xf32>
    %29 = tpu.concatenate %28, %27 in 1 : vector<4x255xf32>, vector<4x1xf32> -> vector<4x256xf32>
    %30 = vector.extract_strided_slice %0 {offsets = [5, 0], sizes = [1, 256], strides = [1, 1]} : vector<9x256xf32> to vector<1x256xf32>
    %31 = vector.broadcast %30 : vector<1x256xf32> to vector<4x256xf32>
    %32 = arith.mulf %29, %31 : vector<4x256xf32>
    %cst_9 = arith.constant 0.000000e+00 : f32
    %33 = vector.broadcast %cst_9 : f32 to vector<4x15xf32>
    %34 = vector.extract_strided_slice %2 {offsets = [0, 15], sizes = [4, 241], strides = [1, 1]} : vector<4x256xf32> to vector<4x241xf32>
    %35 = tpu.concatenate %34, %33 in 1 : vector<4x241xf32>, vector<4x15xf32> -> vector<4x256xf32>
    %36 = vector.extract_strided_slice %0 {offsets = [6, 0], sizes = [1, 256], strides = [1, 1]} : vector<9x256xf32> to vector<1x256xf32>
    %37 = vector.broadcast %36 : vector<1x256xf32> to vector<4x256xf32>
    %38 = arith.mulf %35, %37 : vector<4x256xf32>
    %cst_10 = arith.constant 0.000000e+00 : f32
    %39 = vector.broadcast %cst_10 : f32 to vector<4x16xf32>
    %40 = vector.extract_strided_slice %2 {offsets = [0, 16], sizes = [4, 240], strides = [1, 1]} : vector<4x256xf32> to vector<4x240xf32>
    %41 = tpu.concatenate %40, %39 in 1 : vector<4x240xf32>, vector<4x16xf32> -> vector<4x256xf32>
    %42 = vector.extract_strided_slice %0 {offsets = [7, 0], sizes = [1, 256], strides = [1, 1]} : vector<9x256xf32> to vector<1x256xf32>
    %43 = vector.broadcast %42 : vector<1x256xf32> to vector<4x256xf32>
    %44 = arith.mulf %41, %43 : vector<4x256xf32>
    %cst_11 = arith.constant 0.000000e+00 : f32
    %45 = vector.broadcast %cst_11 : f32 to vector<4x17xf32>
    %46 = vector.extract_strided_slice %2 {offsets = [0, 17], sizes = [4, 239], strides = [1, 1]} : vector<4x256xf32> to vector<4x239xf32>
    %47 = tpu.concatenate %46, %45 in 1 : vector<4x239xf32>, vector<4x17xf32> -> vector<4x256xf32>
    %48 = vector.extract_strided_slice %0 {offsets = [8, 0], sizes = [1, 256], strides = [1, 1]} : vector<9x256xf32> to vector<1x256xf32>
    %49 = vector.broadcast %48 : vector<1x256xf32> to vector<4x256xf32>
    %50 = arith.mulf %47, %49 : vector<4x256xf32>
    %51 = tpu.concatenate %8, %14, %20, %26, %2, %32, %38, %44, %50 in 0 : vector<4x256xf32>, vector<4x256xf32>, vector<4x256xf32>, vector<4x256xf32>, vector<4x256xf32>, vector<4x256xf32>, vector<4x256xf32>, vector<4x256xf32>, vector<4x256xf32> -> vector<36x256xf32>
    %cst_12 = arith.constant dense<0.000000e+00> : vector<16x256xf32>
    %52 = tpu.matmul %1, %51, %cst_12 {dimension_numbers = #tpu.dot_dimension_numbers<[1], [0], [0], [1], [0, 0, 1, 1], [], []>} : vector<16x36xf32>, vector<36x256xf32>, vector<16x256xf32> -> vector<16x256xf32>
    %c0_13 = arith.constant 0 : index
    %c0_14 = arith.constant 0 : index
    %53 = vector.load %arg4[%c0_13, %c0_14] : memref<16x1xf32, #tpu.memory_space<vmem>>, vector<16x1xf32>
    %54 = vector.broadcast %53 : vector<16x1xf32> to vector<16x256xf32>
    %55 = arith.addf %52, %54 : vector<16x256xf32>
    %c0_15 = arith.constant 0 : index
    %c0_16 = arith.constant 0 : index
    %56 = vector.load %arg5[%c0_15, %c0_16] : memref<4x144xf32, #tpu.memory_space<vmem>>, vector<4x144xf32>
    %cst_17 = arith.constant 0.000000e+00 : f32
    %57 = vector.broadcast %cst_17 : f32 to vector<16x17xf32>
    %58 = vector.extract_strided_slice %55 {offsets = [0, 0], sizes = [16, 239], strides = [1, 1]} : vector<16x256xf32> to vector<16x239xf32>
    %59 = tpu.concatenate %57, %58 in 1 : vector<16x17xf32>, vector<16x239xf32> -> vector<16x256xf32>
    %60 = vector.extract_strided_slice %0 {offsets = [0, 0], sizes = [1, 256], strides = [1, 1]} : vector<9x256xf32> to vector<1x256xf32>
    %61 = vector.broadcast %60 : vector<1x256xf32> to vector<16x256xf32>
    %62 = arith.mulf %59, %61 : vector<16x256xf32>
    %cst_18 = arith.constant 0.000000e+00 : f32
    %63 = vector.broadcast %cst_18 : f32 to vector<16x16xf32>
    %64 = vector.extract_strided_slice %55 {offsets = [0, 0], sizes = [16, 240], strides = [1, 1]} : vector<16x256xf32> to vector<16x240xf32>
    %65 = tpu.concatenate %63, %64 in 1 : vector<16x16xf32>, vector<16x240xf32> -> vector<16x256xf32>
    %66 = vector.extract_strided_slice %0 {offsets = [1, 0], sizes = [1, 256], strides = [1, 1]} : vector<9x256xf32> to vector<1x256xf32>
    %67 = vector.broadcast %66 : vector<1x256xf32> to vector<16x256xf32>
    %68 = arith.mulf %65, %67 : vector<16x256xf32>
    %cst_19 = arith.constant 0.000000e+00 : f32
    %69 = vector.broadcast %cst_19 : f32 to vector<16x15xf32>
    %70 = vector.extract_strided_slice %55 {offsets = [0, 0], sizes = [16, 241], strides = [1, 1]} : vector<16x256xf32> to vector<16x241xf32>
    %71 = tpu.concatenate %69, %70 in 1 : vector<16x15xf32>, vector<16x241xf32> -> vector<16x256xf32>
    %72 = vector.extract_strided_slice %0 {offsets = [2, 0], sizes = [1, 256], strides = [1, 1]} : vector<9x256xf32> to vector<1x256xf32>
    %73 = vector.broadcast %72 : vector<1x256xf32> to vector<16x256xf32>
    %74 = arith.mulf %71, %73 : vector<16x256xf32>
    %cst_20 = arith.constant 0.000000e+00 : f32
    %75 = vector.broadcast %cst_20 : f32 to vector<16x1xf32>
    %76 = vector.extract_strided_slice %55 {offsets = [0, 0], sizes = [16, 255], strides = [1, 1]} : vector<16x256xf32> to vector<16x255xf32>
    %77 = tpu.concatenate %75, %76 in 1 : vector<16x1xf32>, vector<16x255xf32> -> vector<16x256xf32>
    %78 = vector.extract_strided_slice %0 {offsets = [3, 0], sizes = [1, 256], strides = [1, 1]} : vector<9x256xf32> to vector<1x256xf32>
    %79 = vector.broadcast %78 : vector<1x256xf32> to vector<16x256xf32>
    %80 = arith.mulf %77, %79 : vector<16x256xf32>
    %cst_21 = arith.constant 0.000000e+00 : f32
    %81 = vector.broadcast %cst_21 : f32 to vector<16x1xf32>
    %82 = vector.extract_strided_slice %55 {offsets = [0, 1], sizes = [16, 255], strides = [1, 1]} : vector<16x256xf32> to vector<16x255xf32>
    %83 = tpu.concatenate %82, %81 in 1 : vector<16x255xf32>, vector<16x1xf32> -> vector<16x256xf32>
    %84 = vector.extract_strided_slice %0 {offsets = [5, 0], sizes = [1, 256], strides = [1, 1]} : vector<9x256xf32> to vector<1x256xf32>
    %85 = vector.broadcast %84 : vector<1x256xf32> to vector<16x256xf32>
    %86 = arith.mulf %83, %85 : vector<16x256xf32>
    %cst_22 = arith.constant 0.000000e+00 : f32
    %87 = vector.broadcast %cst_22 : f32 to vector<16x15xf32>
    %88 = vector.extract_strided_slice %55 {offsets = [0, 15], sizes = [16, 241], strides = [1, 1]} : vector<16x256xf32> to vector<16x241xf32>
    %89 = tpu.concatenate %88, %87 in 1 : vector<16x241xf32>, vector<16x15xf32> -> vector<16x256xf32>
    %90 = vector.extract_strided_slice %0 {offsets = [6, 0], sizes = [1, 256], strides = [1, 1]} : vector<9x256xf32> to vector<1x256xf32>
    %91 = vector.broadcast %90 : vector<1x256xf32> to vector<16x256xf32>
    %92 = arith.mulf %89, %91 : vector<16x256xf32>
    %cst_23 = arith.constant 0.000000e+00 : f32
    %93 = vector.broadcast %cst_23 : f32 to vector<16x16xf32>
    %94 = vector.extract_strided_slice %55 {offsets = [0, 16], sizes = [16, 240], strides = [1, 1]} : vector<16x256xf32> to vector<16x240xf32>
    %95 = tpu.concatenate %94, %93 in 1 : vector<16x240xf32>, vector<16x16xf32> -> vector<16x256xf32>
    %96 = vector.extract_strided_slice %0 {offsets = [7, 0], sizes = [1, 256], strides = [1, 1]} : vector<9x256xf32> to vector<1x256xf32>
    %97 = vector.broadcast %96 : vector<1x256xf32> to vector<16x256xf32>
    %98 = arith.mulf %95, %97 : vector<16x256xf32>
    %cst_24 = arith.constant 0.000000e+00 : f32
    %99 = vector.broadcast %cst_24 : f32 to vector<16x17xf32>
    %100 = vector.extract_strided_slice %55 {offsets = [0, 17], sizes = [16, 239], strides = [1, 1]} : vector<16x256xf32> to vector<16x239xf32>
    %101 = tpu.concatenate %100, %99 in 1 : vector<16x239xf32>, vector<16x17xf32> -> vector<16x256xf32>
    %102 = vector.extract_strided_slice %0 {offsets = [8, 0], sizes = [1, 256], strides = [1, 1]} : vector<9x256xf32> to vector<1x256xf32>
    %103 = vector.broadcast %102 : vector<1x256xf32> to vector<16x256xf32>
    %104 = arith.mulf %101, %103 : vector<16x256xf32>
    %105 = tpu.concatenate %62, %68, %74, %80, %55, %86, %92, %98, %104 in 0 : vector<16x256xf32>, vector<16x256xf32>, vector<16x256xf32>, vector<16x256xf32>, vector<16x256xf32>, vector<16x256xf32>, vector<16x256xf32>, vector<16x256xf32>, vector<16x256xf32> -> vector<144x256xf32>
    %cst_25 = arith.constant dense<0.000000e+00> : vector<4x256xf32>
    %106 = tpu.matmul %56, %105, %cst_25 {dimension_numbers = #tpu.dot_dimension_numbers<[1], [0], [0], [1], [0, 0, 1, 1], [], []>} : vector<4x144xf32>, vector<144x256xf32>, vector<4x256xf32> -> vector<4x256xf32>
    %c0_26 = arith.constant 0 : index
    %c0_27 = arith.constant 0 : index
    %107 = vector.load %arg6[%c0_26, %c0_27] : memref<4x1xf32, #tpu.memory_space<vmem>>, vector<4x1xf32>
    %108 = vector.broadcast %107 : vector<4x1xf32> to vector<4x256xf32>
    %109 = arith.addf %106, %108 : vector<4x256xf32>
    %c0_28 = arith.constant 0 : index
    %c0_29 = arith.constant 0 : index
    %110 = vector.load %arg7[%c0_28, %c0_29] : memref<4x256xf32, #tpu.memory_space<vmem>>, vector<4x256xf32>
    tpu.vector_store %arg7[%c0_28, %c0_29], %109 {strides = array<i32>} : memref<4x256xf32, #tpu.memory_space<vmem>>, vector<4x256xf32>,
    return
  }
  func.func @transform_0(%arg0: i32) -> (i32, i32) {
    %c0_i32 = arith.constant 0 : i32
    %c0_i32_0 = arith.constant 0 : i32
    return %c0_i32, %arg0 : i32, i32
  }
  func.func @transform_1(%arg0: i32) -> (i32, i32) {
    %c0_i32 = arith.constant 0 : i32
    %c0_i32_0 = arith.constant 0 : i32
    %c0_i32_1 = arith.constant 0 : i32
    return %c0_i32, %c0_i32_0 : i32, i32
  }
  func.func @transform_2(%arg0: i32) -> (i32, i32) {
    %c0_i32 = arith.constant 0 : i32
    %c0_i32_0 = arith.constant 0 : i32
    %c0_i32_1 = arith.constant 0 : i32
    return %c0_i32, %c0_i32_0 : i32, i32
  }
  func.func @transform_3(%arg0: i32) -> (i32, i32) {
    %c0_i32 = arith.constant 0 : i32
    %c0_i32_0 = arith.constant 0 : i32
    %c0_i32_1 = arith.constant 0 : i32
    return %c0_i32, %c0_i32_0 : i32, i32
  }
  func.func @transform_4(%arg0: i32) -> (i32, i32) {
    %c0_i32 = arith.constant 0 : i32
    %c0_i32_0 = arith.constant 0 : i32
    %c0_i32_1 = arith.constant 0 : i32
    return %c0_i32, %c0_i32_0 : i32, i32
  }
  func.func @transform_5(%arg0: i32) -> (i32, i32) {
    %c0_i32 = arith.constant 0 : i32
    %c0_i32_0 = arith.constant 0 : i32
    %c0_i32_1 = arith.constant 0 : i32
    return %c0_i32, %c0_i32_0 : i32, i32
  }
  func.func @transform_6(%arg0: i32) -> (i32, i32) {
    %c0_i32 = arith.constant 0 : i32
    %c0_i32_0 = arith.constant 0 : i32
    return %c0_i32, %arg0 : i32, i32
  }
}

</mosaic_0001>

<bundles_post_ra>
// kernel: tpu_custom_call.1
= control target key start
LH: loop header
LB: loop body
LE: loop exit
PB: predicated region body
PF: predicated region fallthrough
CT: control target
= control target key end

     0   :  { %11 = vsyncpa [#allocation3], 0  ;;  %s1737_s0 = inlined_call_operand.vmem [shape: f32[4,512], index: 0, kind: input, shape index: {}]   ;;  %s1738_s1 = inlined_call_operand.hbm [shape: f32[9,256], index: 1, kind: input, shape index: {}]   ;;  %s1739_s2 = inlined_call_operand.hbm [shape: f32[16,36], index: 2, kind: input, shape index: {}]   ;;  %s1740_s3 = inlined_call_operand.vmem [shape: f32[16,1], index: 3, kind: input, shape index: {}]   ;;  %s1741_s4 = inlined_call_operand.vmem [shape: f32[4,144], index: 4, kind: input, shape index: {}]   ;;  %s1742_s5 = inlined_call_operand.vmem [shape: f32[4,1], index: 5, kind: input, shape index: {}]   ;;  %s1743_s6 = inlined_call_operand.hbm [shape: f32[4,512], index: 6, kind: output, shape index: {}]  }
   0x1   :  { %12 = vsyncpa [#allocation6], 0 }
   0x2   :  { %13 = vsyncpa [#allocation4], 0 }
   0x3   :  { %15 = vsyncpa [#allocation4 + $0x1], 0  ;;  %s1253_s21 = smov 0   ;;  %s1255_s22 = smov 0  }
   0x4   :  { %s1257_s23 = smov 0   ;;  %s1259_s24 = smov 0  }
   0x5 LB: > { %s1274_s25 = sadd.s32 4294967295, %s1199_s24   ;;  %s927_s26 = sadd.s32 4294967294, %s1199_s24   ;;  %s1199_s24 = sphi %s1259_s24, %s1761_s24   ;;  %s1195_s23 = sphi %s1257_s23, %s1760_s23   ;;  %s1191_s22 = sphi %s1255_s22, %s1759_s22   ;;  %s1187_s21 = sphi %s1253_s21, %s1758_s21  }
   0x6   : > { %s1278_s27 = sadd.s32 1, %s1199_s24   ;;  %s159_s28 = sadd.s32 1, %s1195_s23 }
   0x7   : > { %s156_s29 = ssub.s32 %s1199_s24, %s1278_s27  ;;  %p169_p0 = scmp.ne.s32.totalorder %s1195_s23, %s1191_s22 }
   0x8   : > { %p157_p1 = scmp.eq.s32.totalorder %s156_s29, 0  ;;  %p170_p2 = scmp.eq.s32.totalorder %s1274_s25, 1 }
   0x9   : > { %p175_p3 = scmp.ne.s32.totalorder %s1191_s22, %s1187_s21  ;;  %p176_p4 = scmp.eq.s32.totalorder %s927_s26, 1 }
   0xa   : > { %s1289_s30 = scalar_select %p157_p1, %s1195_s23, %s159_s28  }
   0xb   : > { %p1291_p5 = por %p170_p2, %p169_p0  ;;  %p1295_p6 = por %p176_p4, %p175_p3 }
   0xc   : > { %p928_p7 = scmp.ge.s32.totalorder %s1199_s24, 1  ;;  %p183_p8 = scmp.lt.s32.totalorder %s1199_s24, 3 }
   0xd   : > { %s1747_s7 = scalar_select %p1291_p5, 1, 0 }
   0xe   : > { %s1748_s8 = scalar_select %p1295_p6, 1, 0 }
   0xf   : > { %p1744_p9 = scmp.eq.s32.totalorder %s1274_s25, 0  ;;  %p1302_p10 = pnand %p928_p7, %p183_p8 }
  0x10   : > { %s1201_s10 = smov [#allocation2]   ;;  %s1202_s13 = smov [#allocation5]  }
  0x11   : > { %s1749_s9 = scalar_select %p1302_p10, 1, 0 }
  0x12   : > { %s195_s11 = sshll.u32 %s1201_s10, 4  ;;  %p1005_p11 = pneg %p1302_p10  ;;  %s196_s11 = int_to_ptr.vmem [resolvable:$true] %s195_s11 }
  0x13   : > { %s208_s14 = sshll.u32 %s1202_s13, 4  ;;  %s1073_s17 = scalar_lea.hbm %s1738_s1, 512  ;;  %s1314_s14 = int_to_ptr.vmem [resolvable:$true] %s208_s14 }
  0x14   : > { %p1310_p12 = pnand %p1744_p9, %p1005_p11  ;;  %p1074_p13 = scmp.ne.s32.totalorder %s1738_s1, %s1073_s17 }
  0x15   : > { %p1080_p3 = scmp.lt.u32.totalorder %s1073_s17, %s1738_s1 }
  0x16   : > { %p1075_p0 = pneg %p1310_p12 }
  0x18   : > { %p1076_p1 = pnand %p1075_p0, %p1074_p13 }
  0x1a   : > { %p1077_p2 = pneg %p1076_p1 }
  0x1c   : > { %p1082_p4 = pnand %p1080_p3, %p1077_p2 }
  0x1e   : > { %1085 = shalt.err (!%p1082_p4)
}
  0x1f   : > { %s1086_s28 = scalar_lea.vmem %s196_s11, 512  ;;  %p1094_p9 = scmp.lt.s32.totalorder %s196_s11, %s196_s11 }
  0x20   : > { %p1087_p7 = scmp.ne.s32.totalorder %s196_s11, %s1086_s28  ;;  %p1095_p6 = scmp.lt.s32.totalorder %s1086_s28, %s1086_s28 }
  0x22   : > { %p1089_p8 = pnand %p1087_p7, %p1075_p0  ;;  %p1096_p5 = por %p1095_p6, %p1094_p9 }
  0x24   : > { %p1090_p11 = pneg %p1089_p8 }
  0x26   : > { %p1097_p10 = pnand %p1096_p5, %p1090_p11 }
  0x28   : > { %1100 = shalt.err (!%p1097_p10)
}
  0x29   : > { %s1203_s29 = smov 256   ;;  %s1204_s10 = smov 16  }
  0x2a   : > { %1008 = dma.hbm_to_vmem [thread:$0]  (!%p1310_p12), %s1738_s1, 512, %s196_s11, [#allocation3], %s1203_s29, %s1203_s29, %s1204_s10  }
  0x2b   : > { %s1101_s18 = scalar_lea.hbm %s1739_s2, 256 }
  0x2c   : > { %p1102_p13 = scmp.ne.s32.totalorder %s1739_s2, %s1101_s18  ;;  %p1108_p9 = scmp.lt.u32.totalorder %s1101_s18, %s1739_s2 }
  0x2e   : > { %p1104_p5 = pnand %p1102_p13, %p1075_p0 }
  0x30   : > { %p1105_p6 = pneg %p1104_p5 }
  0x32   : > { %p1110_p10 = pnand %p1108_p9, %p1105_p6 }
  0x34   : > { %1113 = shalt.err (!%p1110_p10)
}
  0x35   : > { %s1114_s11 = scalar_lea.vmem %s1314_s14, 256  ;;  %p1122_p4 = scmp.lt.s32.totalorder %s1314_s14, %s1314_s14 }
  0x36   : > { %p1115_p1 = scmp.ne.s32.totalorder %s1314_s14, %s1114_s11  ;;  %p1123_p7 = scmp.lt.s32.totalorder %s1114_s11, %s1114_s11 }
  0x38   : > { %p1117_p2 = pnand %p1115_p1, %p1075_p0  ;;  %p1124_p8 = por %p1123_p7, %p1122_p4 }
  0x3a   : > { %p1118_p3 = pneg %p1117_p2 }
  0x3c   : > { %p1125_p11 = pnand %p1124_p8, %p1118_p3 }
  0x3e   : > { %1128 = shalt.err (!%p1125_p11)
}
  0x3f   : > { %s1205_s29 = smov 128   ;;  %s1206_s10 = smov 8  }
  0x40   : > { %1011 = dma.hbm_to_vmem [thread:$0]  (!%p1310_p12), %s1739_s2, 256, %s1314_s14, [#allocation6], %s1205_s29, %s1205_s29, %s1206_s10  }
  0x41   : > { %p1751_p13 = scmp.ne.s32.totalorder %s1749_s9, 0 }
  0x42   : > { %p1752_p0 = scmp.eq.s32.totalorder (!%p1751_p13), %s1274_s25, 0 }
  0x43   : > { %242 = sbr.rel (%p1751_p13) target bundleno = 865 (0x361), region = 44 }
  0x4a   : > { %1174 = dma.done.wait (%p1752_p0), [#allocation3], 512   ;;  %p1753_p5 = pmov %p1752_p0 }
  0x4b   : > { %p1754_p6 = pmov %p1752_p0 }
  0x4c   : > { %1176 = vsyncadd (%p1753_p5), [#allocation3], 4294966784 }
  0x4d   : > { %1178 = dma.done.wait (%p1754_p6), [#allocation6], 256   ;;  %p1755_p9 = pmov %p1752_p0 }
  0x4e   : > { %s936_s12 = sshll.u32 %s1274_s25, 1  ;;  %s1207_s18 = smov 1   ;;  %v1213_v2 = vmov 0.0   ;;  %v1216_v3 = vmov 0   ;;  %v478_v4 = vld [vmem:[%s1740_s3] sm:$0xff]  ;;  %v479_v5 = vld [vmem:[%s1740_s3 + $0x8] sm:$0xff]  ;;  %v301_v6 = vlaneseq }
  0x4f   : > { %1180 = vsyncadd (%p1755_p9), [#allocation6], 4294967040  ;;  %p277_p10 = scmp.lt.s32.totalorder %s936_s12, 3  ;;  %s1208_s19 = smov 16   ;;  %567 = vmatprep.mubr.f32.mxu0 %v1213_v2  ;;  %1069 = vset.pattern.permute.xlu0 %v1216_v3  ;;  %v1426_v12 = vld [vmem:[#allocation2] sm:$0xff]  ;;  %vm353_vm0 = vcmask 7168  }
  0x50   : > { %s1209_s20 = smov 17   ;;  %s1210_s26 = smov 15   ;;  %1070 = vset.pattern.permute.xlu1 %v1216_v3  ;;  %v1422_v7 = vshrl.u32 %v301_v6, 7  ;;  %vm315_vm1 = vcmask 130048   ;;  %v1428_v13 = vld [vmem:[#allocation2 + $0x8] sm:$0xff]  ;;  %vm296_vm2 = vcmask 138240  }
  0x51   : > { %s1763_s12 = smov (!%p277_p10, %s936_s12), 3  ;;  %s1211_s28 = smov 112   ;;  %vm334_vm3 = vcmask 121856   ;;  %vm469_vm4 = vcmask 1043456   ;;  %vm372_vm5 = vcmask 1039360   ;;  %vm410_vm6 = vcmask 916480  }
  0x52   : > { %s937_s14 = sshll.u32 %s1763_s12, 2  ;;  %s1212_s11 = smov 127   ;;  %v360_v10 = vsub.s32 3, %v1422_v7  ;;  %v322_v11 = vsub.s32 1, %v1422_v7  ;;  %v303_v14 = vsub.s32 0, %v1422_v7  ;;  %v341_v19 = vsub.s32 2, %v1422_v7 }
  0x53   : > { %s280_s17 = scalar_lea.vmem %s1737_s0, %s937_s14  ;;  %s1214_s29 = smov 113   ;;  %v379_v38 = vsub.s32 5, %v1422_v7  ;;  %v417_v43 = vsub.s32 7, %v1422_v7  ;;  %v398_v62 = vsub.s32 6, %v1422_v7  ;;  %vm391_vm7 = vcmask 924672  }
  0x54   : > { %v1377_v0 = vld [vmem:[%s280_s17] sm:$0xff]  ;;  %s1215_s10 = smov 111   ;;  %v1432_v17 = vrot.slane %v1426_v12, %v360_v10  ;;  %v1435_v18 = vrot.slane %v1426_v12, %v322_v11  ;;  %v1441_v22 = vrot.slane %v1428_v13, %v360_v10  ;;  %v1444_v23 = vrot.slane %v1428_v13, %v322_v11  ;;  %p1756_p1 = scmp.ne.s32.totalorder %s1747_s7, 0 }
  0x55   : > { %349 = vrot.lane.b32.xlu1 %v1377_v0, %s1207_s18  ;;  %311 = vrot.lane.b32.xlu0 %v1377_v0, %s1208_s19  ;;  %v1385_v1 = vcombine.high %v1377_v0, %v1377_v0  ;;  %v1448_v25 = vrot.slane %v1426_v12, %v303_v14  ;;  %v1451_v27 = vrot.slane %v1428_v13, %v303_v14  ;;  %vm429_vm8 = vcmask 908288  }
  0x56   : > { %v1460_v35 = vrot.slane %v1426_v12, %v341_v19  ;;  %v1463_v36 = vrot.slane %v1428_v13, %v341_v19  ;;  %v1475_v52 = vrot.slane %v1428_v13, %v379_v38  ;;  %v1484_v63 = vrot.slane %v1428_v13, %v417_v43 }
  0x57   : > { %v1487_v3 = vrot.slane %v1426_v12, %v417_v43  ;;  %v1497_v11 = vrot.slane %v1426_v12, %v398_v62  ;;  %v1503_v19 = vrot.slane %v1428_v13, %v398_v62  ;;  %vm490_vm9 = vcmask 293888   ;;  %v745_v62 = vld [vmem:[%s1742_s5] sm:$0xf] }
  0x59   : > { %292 = vrot.lane.b32.xlu0 %v1377_v0, %s1209_s20  ;;  %351 = vrot.lane.b32.xlu1 %v1385_v1, %s1207_s18 }
  0x5d   : > { %294 = vrot.lane.b32.xlu1 %v1385_v1, %s1209_s20  ;;  %313 = vrot.lane.b32.xlu0 %v1385_v1, %s1208_s19 }
  0x61   : > { %332 = vrot.lane.b32.xlu1 %v1385_v1, %s1210_s26  ;;  %330 = vrot.lane.b32.xlu0 %v1377_v0, %s1210_s26 }
  0x65   : > { %408 = vrot.lane.b32.xlu1 %v1385_v1, %s1211_s28  ;;  %370 = vrot.lane.b32.xlu0 %v1385_v1, %s1212_s11 }
  0x69   : > { %406 = vrot.lane.b32.xlu1 %v1377_v0, %s1211_s28  ;;  %368 = vrot.lane.b32.xlu0 %v1377_v0, %s1212_s11 }
  0x6d   : > { %387 = vrot.lane.b32.xlu1 %v1377_v0, %s1214_s29  ;;  %389 = vrot.lane.b32.xlu0 %v1385_v1, %s1214_s29 }
  0x71   : > { %425 = vrot.lane.b32.xlu1 %v1377_v0, %s1215_s10  ;;  %427 = vrot.lane.b32.xlu0 %v1385_v1, %s1215_s10 }
  0x75   : > { %482 = vperm.xlu0 %1069, %v478_v4   ;;  %487 = vperm.xlu1 %1070, %v479_v5   ;;  %v1490_v4 = vrot.slane %v1426_v12, %v379_v38 }
  0xc7   : > { %v350_v8 = vpop.permute.xlu1 %349  ;;  %v312_v9 = vpop.permute.xlu0 %311 }
  0xc8   : > { %v357_v20 = vsel %vm353_vm0, 0.0, %v350_v8  ;;  %v319_v21 = vsel %vm315_vm1, 0.0, %v312_v9 }
  0xc9   : > { %v366_v29 = vmul.f32 %v1432_v17, %v357_v20  ;;  %v328_v30 = vmul.f32 %v1435_v18, %v319_v21 }
  0xcb   : > { %v293_v15 = vpop.permute.xlu0 %292  ;;  %v352_v16 = vpop.permute.xlu1 %351  ;;  %v452_v44 = vrot.slane %v366_v29, 4  ;;  %v446_v45 = vrot.slane %v328_v30, 4 }
  0xcc   : > { %v354_v24 = vsel %vm353_vm0, %v350_v8, %v352_v16  ;;  %v300_v31 = vsel %vm296_vm2, 0.0, %v293_v15 }
  0xcd   : > { %v367_v33 = vmul.f32 %v1441_v22, %v354_v24  ;;  %v309_v39 = vmul.f32 %v1448_v25, %v300_v31 }
  0xcf   : > { %v295_v26 = vpop.permute.xlu1 %294  ;;  %v314_v28 = vpop.permute.xlu0 %313  ;;  %v453_v48 = vrot.slane %v367_v33, 4  ;;  %v470_v57 = vsel %vm469_vm4, %v309_v39, %v446_v45  ;;  %v1509_v33 = vld [vmem:[#allocation2 + $0x18] ss:$0 sm:$0xff] }
  0xd0   : > { %v316_v32 = vsel %vm315_vm1, %v312_v9, %v314_v28  ;;  %v297_v37 = vsel %vm296_vm2, %v293_v15, %v295_v26 }
  0xd1   : > { %v329_v34 = vmul.f32 %v1444_v23, %v316_v32  ;;  %v310_v49 = vmul.f32 %v1451_v27, %v297_v37 }
  0xd3   : > { %v447_v40 = vrot.slane %v329_v34, 4  ;;  %v333_v41 = vpop.permute.xlu1 %332  ;;  %v331_v42 = vpop.permute.xlu0 %330 }
  0xd4   : > { %v335_v46 = vsel %vm334_vm3, %v331_v42, %v333_v41  ;;  %v338_v47 = vsel %vm334_vm3, 0.0, %v331_v42  ;;  %v1517_v41 = vld [vmem:[#allocation2 + $0x10] ss:$0 sm:$0xff] }
  0xd5   : > { %v347_v50 = vmul.f32 %v1460_v35, %v338_v47  ;;  %v348_v51 = vmul.f32 %v1463_v36, %v335_v46  ;;  %v471_v55 = vsel %vm469_vm4, %v310_v49, %v447_v40  ;;  %v287_v47 = vld [vmem:[#allocation5] sm:$0xff] }
  0xd7   : > { %v409_v53 = vpop.permute.xlu1 %408  ;;  %v371_v54 = vpop.permute.xlu0 %370  ;;  %v473_v56 = vsel %vm469_vm4, %v348_v51, %v453_v48  ;;  %v472_v58 = vsel %vm469_vm4, %v347_v50, %v452_v44 }
  0xd8   : > { %v376_v59 = vsel %vm372_vm5, %v371_v54, 0.0  ;;  %v951_v60 = vpack.c.bf16 %v473_v56, %v471_v55  ;;  %v953_v61 = vpack.c.bf16 %v472_v58, %v470_v57  ;;  %v414_v5 = vsel %vm410_vm6, %v409_v53, 0.0 }
  0xd9   : > { %v386_v6 = vmul.f32 %v1475_v52, %v376_v59  ;;  %v424_v14 = vmul.f32 %v1484_v63, %v414_v5 }
  0xda   : > { %952 = vmatprep.subr.bf16.mxu0 %v951_v60  ;;  %v1595_v60 = vld [vmem:[%s1741_s4] sm:$0xff] }
  0xdb   : > { %v407_v8 = vpop.permute.xlu1 %406  ;;  %v369_v9 = vpop.permute.xlu0 %368  ;;  %954 = vmatpush1.bf16.msra.mxu0 %v953_v61  ;;  %v460_v20 = vrot.slane %v386_v6, 4  ;;  %v466_v12 = vrot.slane %v424_v14, 4  ;;  %v752_v61 = vcombine.high %v1595_v60, %v1595_v60 }
  0xdc   : > { %v411_v10 = vsel %vm410_vm6, %v407_v8, %v409_v53  ;;  %v373_v7 = vsel %vm372_vm5, %v369_v9, %v371_v54 }
  0xdd   : > { %v423_v15 = vmul.f32 %v1487_v3, %v411_v10  ;;  %v385_v16 = vmul.f32 %v1490_v4, %v373_v7  ;;  %v475_v37 = vsel %vm469_vm4, %v1385_v1, %v460_v20  ;;  %944 = vmatprep.mubr.msk.f32.mxu1 %vm315_vm1, %v752_v61 }
  0xdf   : > { %v459_v21 = vrot.slane %v385_v16, 4  ;;  %v388_v24 = vpop.permute.xlu1 %387  ;;  %v390_v26 = vpop.permute.xlu0 %389  ;;  %v465_v30 = vrot.slane %v423_v15, 4 }
  0xe0   : > { %v392_v28 = vsel %vm391_vm7, %v388_v24, %v390_v26  ;;  %v395_v29 = vsel %vm391_vm7, %v390_v26, 0.0 }
  0xe1   : > { %v404_v31 = vmul.f32 %v1497_v11, %v392_v28  ;;  %v405_v32 = vmul.f32 %v1503_v19, %v395_v29  ;;  %v474_v39 = vsel %vm469_vm4, %v1377_v0, %v459_v21  ;;  %v288_v0 = vld [vmem:[#allocation5 + $0x8] sm:$0xff] }
  0xe3   : > { %v426_v34 = vpop.permute.xlu1 %425  ;;  %v428_v13 = vpop.permute.xlu0 %427  ;;  %v477_v38 = vsel %vm469_vm4, %v405_v32, %v466_v12  ;;  %v476_v40 = vsel %vm469_vm4, %v404_v31, %v465_v30 }
  0xe4   : > { %v430_v42 = vsel %vm429_vm8, %v426_v34, %v428_v13  ;;  %v433_v43 = vsel %vm429_vm8, %v428_v13, 0.0  ;;  %v955_v44 = vpack.c.bf16 %v477_v38, %v475_v37  ;;  %v957_v45 = vpack.c.bf16 %v476_v40, %v474_v39 }
  0xe5   : > { %v443_v46 = vmul.f32 %v1509_v33, %v433_v43  ;;  %v442_v1 = vmul.f32 %v1517_v41, %v430_v42 }
  0xe6   : > { %956 = vmatprep.subr.bf16.mxu0 %v955_v44 }
  0xe7   : > { %958 = vmatpush1.bf16.msra.mxu0 %v957_v45 }
  0xe8   : > { %940 = vmatprep.subr.msk.mxu0 %vm469_vm4, %v443_v46 }
  0xeb   : > { %941 = vmatpush1.msk.msra.mxu0 %vm469_vm4, %v442_v1 }
  0xec   : > { %942 = vmatmul.mubr.msk.f32.vlgmr.msra.gmra.mrb[0].mxu0 %vm490_vm9, %v287_v47 }
  0xed   : > { %573 = vmatprep.mubr.f32.mxu0 %v1213_v2 }
  0xf0   : > { %943 = vmatmul.mubr.msk.f32.gmra.mrb[2].mxu0 %vm490_vm9, %v288_v0 }
  0xf4   : > { %v483_v48 = vpop.permute.xlu0 %482  ;;  %v488_v54 = vpop.permute.xlu1 %487 }
 0x1bf   : > { %v569_v49 = vpop.f32.mrb[0].mxu0 }
 0x1c0   : > { %v1526_v50 = vadd.f32 %v569_v49, %v483_v48  ;;  %v571_v51 = vpop.f32.mrb[1].mxu0 }
 0x1c1   : > { %v1528_v53 = vadd.f32 %v571_v51, %v483_v48 }
 0x1c2   : > { %585 = vrot.lane.b32.xlu1 %v1526_v50, %s1209_s20 }
 0x1c3   : > { %v575_v55 = vpop.f32.mrb[2].mxu0  ;;  %587 = vrot.lane.b32.xlu0 %v1528_v53, %s1209_s20 }
 0x1c4   : > { %v1534_v56 = vadd.f32 %v575_v55, %v488_v54  ;;  %v577_v2 = vpop.f32.mrb[3].mxu0 }
 0x1c5   : > { %v1536_v57 = vadd.f32 %v577_v2, %v488_v54 }
 0x1c6   : > { %605 = vrot.lane.b32.xlu1 %v1526_v50, %s1208_s19  ;;  %v977_v58 = vpack.c.bf16 %v1534_v56, %v1526_v50 }
 0x1c7   : > { %607 = vrot.lane.b32.xlu0 %v1528_v53, %s1208_s19  ;;  %v975_v59 = vpack.c.bf16 %v1536_v57, %v1528_v53 }
 0x1ca   : > { %625 = vrot.lane.b32.xlu1 %v1526_v50, %s1210_s26 }
 0x1cb   : > { %627 = vrot.lane.b32.xlu0 %v1528_v53, %s1210_s26 }
 0x1ce   : > { %645 = vrot.lane.b32.xlu1 %v1526_v50, %s1207_s18 }
 0x1cf   : > { %647 = vrot.lane.b32.xlu0 %v1528_v53, %s1207_s18 }
 0x1d2   : > { %665 = vrot.lane.b32.xlu1 %v1526_v50, %s1212_s11 }
 0x1d3   : > { %669 = vrot.lane.b32.xlu0 %v1534_v56, %s1212_s11 }
 0x1d6   : > { %667 = vrot.lane.b32.xlu1 %v1528_v53, %s1212_s11 }
 0x1d7   : > { %689 = vrot.lane.b32.xlu0 %v1534_v56, %s1214_s29 }
 0x1da   : > { %589 = vrot.lane.b32.xlu1 %v1534_v56, %s1209_s20 }
 0x1db   : > { %591 = vrot.lane.b32.xlu0 %v1536_v57, %s1209_s20 }
 0x1de   : > { %609 = vrot.lane.b32.xlu1 %v1534_v56, %s1208_s19 }
 0x1df   : > { %611 = vrot.lane.b32.xlu0 %v1536_v57, %s1208_s19  ;;  %s273_s19 = sand.u32 1, %s1191_s22  }
 0x1e0   : > { %s935_s20 = sshll.u32 %s273_s19, 3  ;;  %s832_s15 = scalar_lea.sflag [#allocation4], %s273_s19 }
 0x1e2   : > { %629 = vrot.lane.b32.xlu1 %v1534_v56, %s1210_s26 }
 0x1e3   : > { %631 = vrot.lane.b32.xlu0 %v1536_v57, %s1210_s26  ;;  %s950_s26 = sshll.u32 %s1274_s25, 7  ;;  %s1217_s25 = smov [#allocation7]  }
 0x1e4   : > { %s1695_s13 = scalar_lea.hbm %s1743_s6, %s950_s26  ;;  %s1133_s14 = sshll.u32 %s1217_s25, 4  ;;  %s1134_s14 = int_to_ptr.vmem [resolvable:$false] %s1133_s14 }
 0x1e5   : > { %s1135_s16 = scalar_lea.vmem %s1134_s14, 256 }
 0x1e6   : > { %649 = vrot.lane.b32.xlu1 %v1534_v56, %s1207_s18 }
 0x1e7   : > { %651 = vrot.lane.b32.xlu0 %v1536_v57, %s1207_s18 }
 0x1ea   : > { %687 = vrot.lane.b32.xlu1 %v1528_v53, %s1214_s29 }
 0x1eb   : > { %709 = vrot.lane.b32.xlu0 %v1534_v56, %s1211_s28 }
 0x1ee   : > { %685 = vrot.lane.b32.xlu1 %v1526_v50, %s1214_s29 }
 0x1ef   : > { %671 = vrot.lane.b32.xlu0 %v1536_v57, %s1212_s11 }
 0x1f2   : > { %707 = vrot.lane.b32.xlu1 %v1528_v53, %s1211_s28 }
 0x1f3   : > { %691 = vrot.lane.b32.xlu0 %v1536_v57, %s1214_s29 }
 0x1f6   : > { %705 = vrot.lane.b32.xlu1 %v1526_v50, %s1211_s28 }
 0x1f7   : > { %711 = vrot.lane.b32.xlu0 %v1536_v57, %s1211_s28  ;;  %s275_s28 = scalar_lea.vmem [#allocation7], %s935_s20 }
 0x1f8   : > { %s846_s11 = sshll.u32 %s275_s28, 4  ;;  %s1697_s11 = int_to_ptr.vmem [resolvable:$true] %s846_s11 }
 0x1f9   : > { %s1129_s12 = scalar_lea.vmem %s1697_s11, 128  ;;  %p1136_p4 = scmp.lt.s32.totalorder %s1697_s11, %s1134_s14 }
 0x1fa   : > { %727 = vrot.lane.b32.xlu1 %v1528_v53, %s1215_s10  ;;  %p1130_p12 = scmp.ne.s32.totalorder %s1697_s11, %s1129_s12  ;;  %p1137_p7 = scmp.lt.s32.totalorder %s1135_s16, %s1129_s12 }
 0x1fb   : > { %731 = vrot.lane.b32.xlu0 %v1536_v57, %s1215_s10 }
 0x1fc   : > { %p1131_p2 = pnand %p1130_p12, %p1756_p1  ;;  %p1138_p8 = por %p1137_p7, %p1136_p4 }
 0x1fe   : > { %725 = vrot.lane.b32.xlu1 %v1526_v50, %s1215_s10  ;;  %p1132_p3 = pneg %p1131_p2 }
 0x1ff   : > { %729 = vrot.lane.b32.xlu0 %v1534_v56, %s1215_s10 }
 0x200   : > { %p1139_p11 = pnand %p1138_p8, %p1132_p3 }
 0x202   : > { %748 = vperm.xlu1 %1070, %v745_v62  }
 0x234   : > { %v586_v5 = vpop.permute.xlu1 %585 }
 0x235   : > { %v588_v6 = vpop.permute.xlu0 %587  ;;  %v599_v29 = vsel %vm296_vm2, 0.0, %v586_v5 }
 0x236   : > { %v593_v26 = vsel %vm296_vm2, %v586_v5, %v588_v6  ;;  %v601_v37 = vmul.f32 %v599_v29, %v1448_v25 }
 0x237   : > { %v602_v34 = vmul.f32 %v593_v26, %v1451_v27 }
 0x238   : > { %v606_v8 = vpop.permute.xlu1 %605 }
 0x239   : > { %v608_v9 = vpop.permute.xlu0 %607  ;;  %v619_v40 = vsel %vm315_vm1, 0.0, %v606_v8 }
 0x23a   : > { %v613_v38 = vsel %vm315_vm1, %v606_v8, %v608_v9 }
 0x23b   : > { %v622_v47 = vmul.f32 %v613_v38, %v1444_v23 }
 0x23c   : > { %v626_v10 = vpop.permute.xlu1 %625 }
 0x23d   : > { %v628_v7 = vpop.permute.xlu0 %627  ;;  %v639_v49 = vsel %vm334_vm3, 0.0, %v626_v10 }
 0x23e   : > { %v633_v0 = vsel %vm334_vm3, %v626_v10, %v628_v7 }
 0x240   : > { %v646_v14 = vpop.permute.xlu1 %645 }
 0x241   : > { %v648_v15 = vpop.permute.xlu0 %647  ;;  %v659_v9 = vsel %vm353_vm0, 0.0, %v646_v14 }
 0x242   : > { %v653_v6 = vsel %vm353_vm0, %v646_v14, %v648_v15 }
 0x244   : > { %v666_v16 = vpop.permute.xlu1 %665 }
 0x245   : > { %v1613_v20 = vpop.permute.xlu0 %669 }
 0x248   : > { %v668_v21 = vpop.permute.xlu1 %667 }
 0x249   : > { %v1615_v24 = vpop.permute.xlu0 %689 }
 0x24c   : > { %v590_v28 = vpop.permute.xlu1 %589 }
 0x24d   : > { %v600_v12 = vsel %vm296_vm2, 0.0, %v590_v28  ;;  %v592_v30 = vpop.permute.xlu0 %591 }
 0x24e   : > { %v603_v31 = vmul.f32 %v600_v12, %v1448_v25  ;;  %v594_v32 = vsel %vm296_vm2, %v590_v28, %v592_v30  ;;  %v621_v25 = vmul.f32 %v619_v40, %v1435_v18 }
 0x24f   : > { %v604_v13 = vmul.f32 %v594_v32, %v1451_v27 }
 0x250   : > { %v610_v39 = vpop.permute.xlu1 %609  ;;  %v961_v1 = vpack.c.bf16 %v603_v31, %v601_v37 }
 0x251   : > { %v620_v42 = vsel %vm315_vm1, 0.0, %v610_v39  ;;  %v612_v43 = vpop.permute.xlu0 %611  ;;  %v959_v44 = vpack.c.bf16 %v604_v13, %v602_v34  ;;  %v673_v34 = vsel %vm372_vm5, %v666_v16, %v668_v21  ;;  %v679_v13 = vsel %vm372_vm5, %v668_v21, 0.0 }
 0x252   : > { %v623_v45 = vmul.f32 %v620_v42, %v1435_v18  ;;  %v614_v46 = vsel %vm315_vm1, %v610_v39, %v612_v43  ;;  %v641_v18 = vmul.f32 %v639_v49, %v1460_v35  ;;  %v681_v39 = vmul.f32 %v673_v34, %v1490_v4 }
 0x253   : > { %v624_v27 = vmul.f32 %v614_v46, %v1444_v23  ;;  %960 = vmatprep.subr.bf16.mxu1 %v959_v44  ;;  %v642_v23 = vmul.f32 %v633_v0, %v1463_v36  ;;  %v682_v40 = vmul.f32 %v679_v13, %v1475_v52 }
 0x254   : > { %962 = vmatpush1.bf16.msra.mxu1 %v961_v1  ;;  %v630_v48 = vpop.permute.xlu1 %629  ;;  %v965_v62 = vpack.c.bf16 %v623_v45, %v621_v25 }
 0x255   : > { %v640_v51 = vsel %vm334_vm3, 0.0, %v630_v48  ;;  %v632_v54 = vpop.permute.xlu0 %631  ;;  %v963_v55 = vpack.c.bf16 %v624_v27, %v622_v47 }
 0x256   : > { %v643_v2 = vmul.f32 %v640_v51, %v1460_v35  ;;  %v634_v61 = vsel %vm334_vm3, %v630_v48, %v632_v54  ;;  %v661_v35 = vmul.f32 %v659_v9, %v1432_v17 }
 0x257   : > { %v644_v5 = vmul.f32 %v634_v61, %v1463_v36  ;;  %964 = vmatprep.subr.bf16.mxu1 %v963_v55  ;;  %v662_v36 = vmul.f32 %v653_v6, %v1441_v22 }
 0x258   : > { %966 = vmatpush1.bf16.msra.mxu1 %v965_v62  ;;  %v650_v8 = vpop.permute.xlu1 %649  ;;  %v969_v12 = vpack.c.bf16 %v643_v2, %v641_v18 }
 0x259   : > { %v660_v10 = vsel %vm353_vm0, 0.0, %v650_v8  ;;  %v652_v7 = vpop.permute.xlu0 %651  ;;  %v967_v26 = vpack.c.bf16 %v644_v5, %v642_v23 }
 0x25a   : > { %v663_v28 = vmul.f32 %v660_v10, %v1432_v17  ;;  %v654_v29 = vsel %vm353_vm0, %v650_v8, %v652_v7 }
 0x25b   : > { %v664_v30 = vmul.f32 %v654_v29, %v1441_v22  ;;  %968 = vmatprep.subr.bf16.mxu1 %v967_v26 }
 0x25c   : > { %970 = vmatpush1.bf16.msra.mxu1 %v969_v12  ;;  %v688_v15 = vpop.permute.xlu1 %687  ;;  %v973_v32 = vpack.c.bf16 %v663_v28, %v661_v35 }
 0x25d   : > { %v710_v31 = vpop.permute.xlu0 %709  ;;  %v971_v14 = vpack.c.bf16 %v664_v30, %v662_v36  ;;  %v699_v42 = vsel %vm391_vm7, %v688_v15, 0.0 }
 0x25f   : > { %972 = vmatprep.subr.bf16.mxu1 %v971_v14 }
 0x260   : > { %974 = vmatpush1.bf16.msra.mxu1 %v973_v32  ;;  %v686_v37 = vpop.permute.xlu1 %685 }
 0x261   : > { %v672_v38 = vpop.permute.xlu0 %671  ;;  %976 = vmatprep.subr.bf16.mxu1 %v975_v59  ;;  %v693_v43 = vsel %vm391_vm7, %v686_v37, %v688_v15 }
 0x262   : > { %v674_v17 = vsel %vm372_vm5, %v1613_v20, %v672_v38  ;;  %v680_v22 = vsel %vm372_vm5, %v672_v38, 0.0 }
 0x263   : > { %v683_v16 = vmul.f32 %v674_v17, %v1490_v4  ;;  %v684_v21 = vmul.f32 %v680_v22, %v1475_v52  ;;  %v702_v4 = vmul.f32 %v699_v42, %v1503_v19  ;;  %v701_v52 = vmul.f32 %v693_v43, %v1497_v11 }
 0x264   : > { %v708_v44 = vpop.permute.xlu1 %707  ;;  %978 = vmatpush1.bf16.msra.mxu1 %v977_v58 }
 0x265   : > { %v692_v53 = vpop.permute.xlu0 %691  ;;  %v979_v57 = vpack.c.bf16 %v684_v21, %v682_v40  ;;  %v981_v59 = vpack.c.bf16 %v683_v16, %v681_v39  ;;  %v719_v50 = vsel %vm410_vm6, %v708_v44, 0.0 }
 0x266   : > { %v694_v20 = vsel %vm391_vm7, %v1615_v24, %v692_v53  ;;  %v700_v45 = vsel %vm391_vm7, %v692_v53, 0.0 }
 0x267   : > { %v703_v46 = vmul.f32 %v694_v20, %v1497_v11  ;;  %v704_v1 = vmul.f32 %v700_v45, %v1503_v19  ;;  %980 = vmatprep.subr.bf16.mxu1 %v979_v57  ;;  %v722_v11 = vmul.f32 %v719_v50, %v1484_v63 }
 0x268   : > { %v706_v56 = vpop.permute.xlu1 %705  ;;  %982 = vmatpush1.bf16.msra.mxu1 %v981_v59 }
 0x269   : > { %v713_v58 = vsel %vm410_vm6, %v706_v56, %v708_v44  ;;  %v712_v47 = vpop.permute.xlu0 %711  ;;  %v983_v27 = vpack.c.bf16 %v704_v1, %v702_v4  ;;  %v985_v24 = vpack.c.bf16 %v703_v46, %v701_v52 }
 0x26a   : > { %v721_v25 = vmul.f32 %v713_v58, %v1487_v3  ;;  %v714_v0 = vsel %vm410_vm6, %v710_v31, %v712_v47  ;;  %v720_v48 = vsel %vm410_vm6, %v712_v47, 0.0 }
 0x26b   : > { %v723_v19 = vmul.f32 %v714_v0, %v1487_v3  ;;  %v724_v49 = vmul.f32 %v720_v48, %v1484_v63  ;;  %984 = vmatprep.subr.bf16.mxu1 %v983_v27 }
 0x26c   : > { %v728_v51 = vpop.permute.xlu1 %727  ;;  %986 = vmatpush1.bf16.msra.mxu1 %v985_v24 }
 0x26d   : > { %v739_v54 = vsel %vm429_vm8, %v728_v51, 0.0  ;;  %v732_v55 = vpop.permute.xlu0 %731  ;;  %v987_v2 = vpack.c.bf16 %v724_v49, %v722_v11  ;;  %v989_v61 = vpack.c.bf16 %v723_v19, %v721_v25 }
 0x26e   : > { %v742_v62 = vmul.f32 %v1509_v33, %v739_v54  ;;  %v740_v23 = vsel %vm429_vm8, %v732_v55, 0.0 }
 0x26f   : > { %v744_v5 = vmul.f32 %v1509_v33, %v740_v23  ;;  %988 = vmatprep.subr.bf16.mxu1 %v987_v2 }
 0x270   : > { %v726_v18 = vpop.permute.xlu1 %725  ;;  %990 = vmatpush1.bf16.msra.mxu1 %v989_v61 }
 0x271   : > { %v733_v63 = vsel %vm429_vm8, %v726_v18, %v728_v51  ;;  %v730_v3 = vpop.permute.xlu0 %729  ;;  %v991_v6 = vpack.c.bf16 %v744_v5, %v742_v62 }
 0x272   : > { %v741_v8 = vmul.f32 %v1517_v41, %v733_v63  ;;  %v734_v9 = vsel %vm429_vm8, %v730_v3, %v732_v55 }
 0x273   : > { %v743_v10 = vmul.f32 %v1517_v41, %v734_v9  ;;  %992 = vmatprep.subr.bf16.mxu1 %v991_v6 }
 0x275   : > { %v993_v7 = vpack.c.bf16 %v743_v10, %v741_v8 }
 0x277   : > { %994 = vmatpush1.bf16.msra.mxu1 %v993_v7 }
 0x27a   : > { %820 = vmatmul.mubr.f32.vlgmr.msra.gmra.mrb[0].mxu1 %v1595_v60 }
 0x281   : > { %v749_v33 = vpop.permute.xlu1 %748 }
 0x34d   : > { %v821_v26 = vpop.f32.mrb[0].mxu1 }
 0x34e   : > { %v822_v28 = vadd.f32 %v821_v26, %v749_v33  ;;  %v823_v29 = vpop.f32.mrb[1].mxu1 }
 0x34f   : > { %v824_v12 = vadd.f32 %v823_v29, %v749_v33 }
 0x351   : > { %v828_v36 = vcombine.low %v822_v28, %v824_v12 }
 0x353   : > { %830 = vst [vmem:[%s275_s28] sm:$0xff] %v828_v36 }
 0x354   : > { %1142 = shalt.err (!%p1139_p11)
}
 0x355   : > { %s1143_s9 = scalar_lea.hbm %s1695_s13, 128  ;;  %s1147_s19 = scalar_lea.hbm %s1743_s6, 256 }
 0x356   : > { %p1144_p13 = scmp.ne.s32.totalorder %s1695_s13, %s1143_s9  ;;  %p1148_p6 = scmp.lt.u32.totalorder %s1695_s13, %s1743_s6 }
 0x357   : > { %p1149_p9 = scmp.lt.u32.totalorder %s1147_s19, %s1143_s9  ;;  %p1151_p12 = scmp.lt.u32.totalorder %s1143_s9, %s1695_s13 }
 0x358   : > { %p1145_p0 = pnand %p1144_p13, %p1756_p1 }
 0x359   : > { %p1150_p10 = por %p1149_p9, %p1148_p6 }
 0x35a   : > { %p1146_p5 = pneg %p1145_p0 }
 0x35b   : > { %p1152_p2 = por %p1151_p12, %p1150_p10 }
 0x35d   : > { %p1153_p3 = pnand %p1152_p2, %p1146_p5 }
 0x35f   : > { %1156 = shalt.err (!%p1153_p3)
}
 0x360   : > { %1003 = dma.vmem_to_hbm [thread:$0]  (%p1756_p1), %s1697_s11, 128, %s1695_s13, %s832_s15  }
 0x361 PF: > { %p1020_p4 = scmp.ge.s32.totalorder %s1199_s24, 2  ;;  %s858_s28 = sand.u32 1, %s1187_s21  }
 0x362   : > { %p1757_p7 = scmp.ne.s32.totalorder %s1748_s8, 0  ;;  %s859_s29 = scalar_lea.sflag [#allocation4], %s858_s28 }
 0x364   : > { %p1013_p8 = pnand %p1020_p4, %p1757_p7 }
 0x366   : > { %1182 = dma.done.wait (!%p1013_p8), %s859_s29, 128  }
 0x367   : > { %1184 = vsyncadd (!%p1013_p8), %s859_s29, 4294967168  ;;  %p18_p11 = scmp.ge.s32.totalorder %s1278_s27, 4   ;;  %s1758_s21 = smov %s1191_s22 }
 0x368   : > { %s1759_s22 = smov %s1195_s23  ;;  %s1760_s23 = smov %s1289_s30 }
 0x369   : > { %s1761_s24 = smov %s1278_s27  ;;  %20 = sbr.rel (!%p18_p11) target bundleno = 5 (0x5), region = 88 }
 0x370   :  { %864 = vsyncpa [#allocation3], 1 }
 0x371   :  { %866 = vsyncpa [#allocation3 + $0x1], 1 }
 0x372   :  { %867 = vsyncpa [#allocation6], 1 }
 0x373   :  { %868 = vsyncpa [#allocation4], 1 }
 0x374   :  { %870 = vsyncpa [#allocation4 + $0x1], 1 }

</bundles_post_ra>
